<compile_context>
chip_gen: v7x
topology: tpu7x:2x2x1
jax: 0.10.0
libtpu: 0.0.40
codegen_flags: <defaults>
</compile_context>

<pallas_src>
import functools

import jax
import jax.numpy as jnp
from jax.experimental import pallas as pl
from jax.experimental.pallas import tpu as pltpu


def _round_up(a, b):
    return ((a + b - 1) // b) * b


def _swc_corr_kernel(x1_ref, x2_ref, out_ref, *, win, tile_n, slab_n):
    """Grid step j: Pearson corr for sliding positions [j*tile_n, (j+1)*tile_n).

    x1_ref/x2_ref: (B, T_pad) raw channel signals, resident in VMEM.
    out_ref:       (B, tile_n) raw correlations, N on lanes (lane-dense).
    """
    j = pl.program_id(0)
    start = pl.multiple_of(j * tile_n, 128)

    # One aligned slab covering every window of this tile (+ 128-aligned halo).
    slab1 = x1_ref[:, pl.ds(start, slab_n)]          # (B, slab_n)
    slab2 = x2_ref[:, pl.ds(start, slab_n)]

    # Five sliding sums via win-1 shifted adds (static shifts, VPU adds).
    a1 = slab1[:, 0:tile_n]
    a2 = slab2[:, 0:tile_n]
    s1, s2 = a1, a2
    s11, s22, s12 = a1 * a1, a2 * a2, a1 * a2
    for k in range(1, win):
        b1 = slab1[:, k:k + tile_n]
        b2 = slab2[:, k:k + tile_n]
        s1 = s1 + b1
        s2 = s2 + b2
        s11 = s11 + b1 * b1
        s22 = s22 + b2 * b2
        s12 = s12 + b1 * b2

    inv_w = jnp.float32(1.0 / win)
    num = s12 - s1 * s2 * inv_w          # sum((x1-m1)*(x2-m2))
    ss1 = s11 - s1 * s1 * inv_w          # sum((x1-m1)^2)
    ss2 = s22 - s2 * s2 * inv_w          # sum((x2-m2)^2)
    # corr = num / (sqrt(ss1)*sqrt(ss2))  ->  one EUP rsqrt + one VPU mul.
    # (Zero-variance windows give inf/NaN exactly like the PyTorch reference.)
    out_ref[...] = num * jax.lax.rsqrt(ss1 * ss2)


def attention_swc_forward(x, window):
    """x: (B, C, T), C >= 2 (only channels 0 and 1 are used).

    Returns (attentions, None); attentions is the squeezed (N, B) array,
    N = T - (3*window - 2) + 1, matching the PyTorch module.
    """
    win = window * 3 - 2
    B, C, T = x.shape
    assert C >= 2, "Attention_SWC uses channels 0 and 1"
    N = T - win + 1
    assert N >= 1, "signal shorter than the sliding window"

    # Tiling: N on lanes, tiles a multiple of 128 (lane-dense output stores).
    tile_n = min(512, _round_up(N, 128))
    n_pad = _round_up(N, tile_n)
    num_tiles = n_pad // tile_n
    halo = _round_up(win - 1, 128) if win > 1 else 0
    slab_n = tile_n + halo
    t_pad = n_pad + halo                     # >= T by construction

    x1 = jnp.pad(x[:, 0, :].astype(jnp.float32), ((0, 0), (0, t_pad - T)))
    x2 = jnp.pad(x[:, 1, :].astype(jnp.float32), ((0, 0), (0, t_pad - T)))

    kernel = functools.partial(
        _swc_corr_kernel, win=win, tile_n=tile_n, slab_n=slab_n)

    cost = pl.CostEstimate(
        flops=int(B * n_pad * (10 * win + 12)),
        transcendentals=int(B * n_pad),
        bytes_accessed=int(4 * (2 * B * t_pad + B * n_pad)),
    )

    corr_pad = pl.pallas_call(
        kernel,
        out_shape=jax.ShapeDtypeStruct((B, n_pad), jnp.float32),
        grid=(num_tiles,),
        in_specs=[
            # Raw signals stay resident (same block every step -> one DMA).
            pl.BlockSpec((B, t_pad), lambda j: (0, 0)),
            pl.BlockSpec((B, t_pad), lambda j: (0, 0)),
        ],
        out_specs=pl.BlockSpec((B, tile_n), lambda j: (0, j)),
        compiler_params=pltpu.CompilerParams(
            dimension_semantics=("parallel",),   # independent N tiles; v7x 2-TC split
        ),
        cost_estimate=cost,
    )(x1, x2)

    # Two-pass epilogue (trivial XLA glue): global mean over the *valid* N
    # positions, then relu; transpose/squeeze to match torch layout.
    corr = corr_pad[:, :N]                              # (B, N)
    avg = jnp.sum(corr, axis=1, keepdims=True) / N      # correlations.sum(0)/N
    attn = jnp.maximum(corr - avg, 0.0)                 # relu(corr - avg)
    attentions = jnp.squeeze(attn.T)                    # (N, B), squeezed
    return attentions, None


def _reference(x, window):
    """Pure-jnp reference mirroring the PyTorch module (for correctness check)."""
    win = window * 3 - 2
    B, C, T = x.shape
    N = T - win + 1
    idx = jnp.arange(N)[:, None] + jnp.arange(win)[None, :]
    w0 = x[:, 0, :][:, idx].astype(jnp.float32)          # (B, N, W)
    w1 = x[:, 1, :][:, idx].astype(jnp.float32)
    v0 = w0 - w0.mean(-1, keepdims=True)
    v1 = w1 - w1.mean(-1, keepdims=True)
    corr = (v0 * v1).sum(-1) / (
        jnp.sqrt((v0 * v0).sum(-1)) * jnp.sqrt((v1 * v1).sum(-1)))
    avg = corr.sum(1, keepdims=True) / N
    return jnp.squeeze(jnp.maximum(corr - avg, 0.0).T)


if __name__ == "__main__":
    key = jax.random.PRNGKey(0)
    B, C, T = 2, 2, 16
    window = 2                                   # window_size = 4 -> N = 13
    x = jax.random.normal(key, (B, C, T), dtype=jnp.float32)

    attn, sectors = attention_swc_forward(x, window)
    attn = jax.block_until_ready(attn)

    expected_n = T - (window * 3 - 2) + 1
    assert attn.shape == (expected_n, B), attn.shape
    assert sectors is None
    assert bool(jnp.all(attn >= 0.0))            # post-ReLU

    ref = jax.block_until_ready(_reference(x, window))
    assert bool(jnp.allclose(attn, ref, atol=1e-4, rtol=1e-4)), (
        jnp.max(jnp.abs(attn - ref)))

    print("KERNEL_OK")
</pallas_src>

<mosaic_0001>
module attributes {stable_mosaic.version = 11 : i64} {
  func.func @_swc_corr_kernel(%arg0: i32, %arg1: memref<2x256xf32, #tpu.memory_space<vmem>>, %arg2: memref<2x256xf32, #tpu.memory_space<vmem>>, %arg3: memref<2x128xf32, #tpu.memory_space<vmem>>) attributes {dimension_semantics = [#tpu.dimension_semantics<parallel>], iteration_bounds = array<i64: 1>, scalar_prefetch = 0 : i64, scratch_operands = 0 : i64, tpu.core_type = #tpu.core_type<tc>, window_params = [{pipeline_mode = #tpu.pipeline_mode<synchronous>, transform_indices = @transform_0, window_bounds = array<i64: 2, 256>}, {pipeline_mode = #tpu.pipeline_mode<synchronous>, transform_indices = @transform_1, window_bounds = array<i64: 2, 256>}, {transform_indices = @transform_2, window_bounds = array<i64: 2, 128>}]} {
    %c128_i32 = arith.constant 128 : i32
    %0 = arith.muli %arg0, %c128_i32 : i32
    %1 = tpu.assume_multiple %0, 128 : i32
    %c0 = arith.constant 0 : index
    %2 = arith.index_cast %1 : i32 to index
    %3 = vector.load %arg1[%c0, %2] : memref<2x256xf32, #tpu.memory_space<vmem>>, vector<2x256xf32>
    %c0_0 = arith.constant 0 : index
    %4 = arith.index_cast %1 : i32 to index
    %5 = vector.load %arg2[%c0_0, %4] : memref<2x256xf32, #tpu.memory_space<vmem>>, vector<2x256xf32>
    %6 = vector.extract_strided_slice %3 {offsets = [0, 0], sizes = [2, 128], strides = [1, 1]} : vector<2x256xf32> to vector<2x128xf32>
    %7 = vector.extract_strided_slice %5 {offsets = [0, 0], sizes = [2, 128], strides = [1, 1]} : vector<2x256xf32> to vector<2x128xf32>
    %8 = arith.mulf %6, %6 : vector<2x128xf32>
    %9 = arith.mulf %7, %7 : vector<2x128xf32>
    %10 = arith.mulf %6, %7 : vector<2x128xf32>
    %11 = vector.extract_strided_slice %3 {offsets = [0, 1], sizes = [2, 128], strides = [1, 1]} : vector<2x256xf32> to vector<2x128xf32>
    %12 = vector.extract_strided_slice %5 {offsets = [0, 1], sizes = [2, 128], strides = [1, 1]} : vector<2x256xf32> to vector<2x128xf32>
    %13 = arith.addf %6, %11 : vector<2x128xf32>
    %14 = arith.addf %7, %12 : vector<2x128xf32>
    %15 = arith.mulf %11, %11 : vector<2x128xf32>
    %16 = arith.addf %8, %15 : vector<2x128xf32>
    %17 = arith.mulf %12, %12 : vector<2x128xf32>
    %18 = arith.addf %9, %17 : vector<2x128xf32>
    %19 = arith.mulf %11, %12 : vector<2x128xf32>
    %20 = arith.addf %10, %19 : vector<2x128xf32>
    %21 = vector.extract_strided_slice %3 {offsets = [0, 2], sizes = [2, 128], strides = [1, 1]} : vector<2x256xf32> to vector<2x128xf32>
    %22 = vector.extract_strided_slice %5 {offsets = [0, 2], sizes = [2, 128], strides = [1, 1]} : vector<2x256xf32> to vector<2x128xf32>
    %23 = arith.addf %13, %21 : vector<2x128xf32>
    %24 = arith.addf %14, %22 : vector<2x128xf32>
    %25 = arith.mulf %21, %21 : vector<2x128xf32>
    %26 = arith.addf %16, %25 : vector<2x128xf32>
    %27 = arith.mulf %22, %22 : vector<2x128xf32>
    %28 = arith.addf %18, %27 : vector<2x128xf32>
    %29 = arith.mulf %21, %22 : vector<2x128xf32>
    %30 = arith.addf %20, %29 : vector<2x128xf32>
    %31 = vector.extract_strided_slice %3 {offsets = [0, 3], sizes = [2, 128], strides = [1, 1]} : vector<2x256xf32> to vector<2x128xf32>
    %32 = vector.extract_strided_slice %5 {offsets = [0, 3], sizes = [2, 128], strides = [1, 1]} : vector<2x256xf32> to vector<2x128xf32>
    %33 = arith.addf %23, %31 : vector<2x128xf32>
    %34 = arith.addf %24, %32 : vector<2x128xf32>
    %35 = arith.mulf %31, %31 : vector<2x128xf32>
    %36 = arith.addf %26, %35 : vector<2x128xf32>
    %37 = arith.mulf %32, %32 : vector<2x128xf32>
    %38 = arith.addf %28, %37 : vector<2x128xf32>
    %39 = arith.mulf %31, %32 : vector<2x128xf32>
    %40 = arith.addf %30, %39 : vector<2x128xf32>
    %41 = arith.mulf %33, %34 : vector<2x128xf32>
    %cst = arith.constant 2.500000e-01 : f32
    %42 = vector.broadcast %cst : f32 to vector<2x128xf32>
    %43 = arith.mulf %41, %42 : vector<2x128xf32>
    %44 = arith.subf %40, %43 : vector<2x128xf32>
    %45 = arith.mulf %33, %33 : vector<2x128xf32>
    %cst_1 = arith.constant 2.500000e-01 : f32
    %46 = vector.broadcast %cst_1 : f32 to vector<2x128xf32>
    %47 = arith.mulf %45, %46 : vector<2x128xf32>
    %48 = arith.subf %36, %47 : vector<2x128xf32>
    %49 = arith.mulf %34, %34 : vector<2x128xf32>
    %cst_2 = arith.constant 2.500000e-01 : f32
    %50 = vector.broadcast %cst_2 : f32 to vector<2x128xf32>
    %51 = arith.mulf %49, %50 : vector<2x128xf32>
    %52 = arith.subf %38, %51 : vector<2x128xf32>
    %53 = arith.mulf %48, %52 : vector<2x128xf32>
    %54 = math.rsqrt %53 : vector<2x128xf32>
    %55 = arith.mulf %44, %54 : vector<2x128xf32>
    %c0_3 = arith.constant 0 : index
    %c0_4 = arith.constant 0 : index
    %56 = vector.load %arg3[%c0_3, %c0_4] : memref<2x128xf32, #tpu.memory_space<vmem>>, vector<2x128xf32>
    tpu.vector_store %arg3[%c0_3, %c0_4], %55 {strides = array<i32>} : memref<2x128xf32, #tpu.memory_space<vmem>>, vector<2x128xf32>,
    return
  }
  func.func @transform_0(%arg0: i32) -> (i32, i32) {
    %c0_i32 = arith.constant 0 : i32
    %c0_i32_0 = arith.constant 0 : i32
    %c0_i32_1 = arith.constant 0 : i32
    return %c0_i32, %c0_i32_0 : i32, i32
  }
  func.func @transform_1(%arg0: i32) -> (i32, i32) {
    %c0_i32 = arith.constant 0 : i32
    %c0_i32_0 = arith.constant 0 : i32
    %c0_i32_1 = arith.constant 0 : i32
    return %c0_i32, %c0_i32_0 : i32, i32
  }
  func.func @transform_2(%arg0: i32) -> (i32, i32) {
    %c0_i32 = arith.constant 0 : i32
    %c0_i32_0 = arith.constant 0 : i32
    return %c0_i32, %arg0 : i32, i32
  }
}

</mosaic_0001>

<bundles_post_ra>
// kernel: tpu_custom_call.1
= control target key start
LH: loop header
LB: loop body
LE: loop exit
PB: predicated region body
PF: predicated region fallthrough
CT: control target
= control target key end

     0   :  { %7 = vsyncpa [#allocation3], 0  ;;  %s337_s0 = inlined_call_operand.hbm [shape: f32[2,256], index: 0, kind: input, shape index: {}]   ;;  %s338_s1 = inlined_call_operand.hbm [shape: f32[2,256], index: 1, kind: input, shape index: {}]   ;;  %s339_s2 = inlined_call_operand.hbm [shape: f32[2,128], index: 2, kind: output, shape index: {}]  }
   0x1   :  { %8 = vsyncpa [#allocation6], 0 }
   0x2   :  { %9 = vsyncpa [#allocation4], 0  ;;  %s259_s9 = smov [#allocation2]   ;;  %s260_s11 = smov [#allocation5]  }
   0x3   :  { %s16_s10 = sshll.u32 %s259_s9, 4  ;;  %s26_s12 = sshll.u32 %s260_s11, 4  ;;  %s17_s10 = int_to_ptr.vmem [resolvable:$true] %s16_s10  ;;  %s27_s12 = int_to_ptr.vmem [resolvable:$true] %s26_s12 }
   0x4   :  { %s187_s15 = scalar_lea.hbm %s337_s0, 64 }
   0x5   :  { %p188_p0 = scmp.ne.s32.totalorder %s337_s0, %s187_s15  ;;  %p191_p1 = scmp.lt.u32.totalorder %s187_s15, %s337_s0 }
   0x7   :  { %p193_p2 = pnand %p191_p1, %p188_p0 }
   0x9   :  { %196 = shalt.err (!%p193_p2)
}
   0xa   :  { %s197_s20 = scalar_lea.vmem %s17_s10, 64  ;;  %p202_p4 = scmp.lt.s32.totalorder %s17_s10, %s17_s10 }
   0xb   :  { %p198_p3 = scmp.ne.s32.totalorder %s17_s10, %s197_s20  ;;  %p203_p5 = scmp.lt.s32.totalorder %s197_s20, %s197_s20 }
   0xd   :  { %p204_p6 = por %p203_p5, %p202_p4 }
   0xf   :  { %p205_p7 = pnand %p204_p6, %p198_p3 }
  0x11   :  { %208 = shalt.err (!%p205_p7)
}
  0x12   :  { %19 = dma.hbm_to_vmem [thread:$0]  %s337_s0, 64, %s17_s10, [#allocation3]  }
  0x13   :  { %s209_s25 = scalar_lea.hbm %s338_s1, 64 }
  0x14   :  { %p210_p8 = scmp.ne.s32.totalorder %s338_s1, %s209_s25  ;;  %p213_p9 = scmp.lt.u32.totalorder %s209_s25, %s338_s1 }
  0x16   :  { %p215_p10 = pnand %p213_p9, %p210_p8 }
  0x18   :  { %218 = shalt.err (!%p215_p10)
}
  0x19   :  { %s219_s30 = scalar_lea.vmem %s27_s12, 64  ;;  %p224_p12 = scmp.lt.s32.totalorder %s27_s12, %s27_s12 }
  0x1a   :  { %p220_p11 = scmp.ne.s32.totalorder %s27_s12, %s219_s30  ;;  %p225_p13 = scmp.lt.s32.totalorder %s219_s30, %s219_s30 }
  0x1c   :  { %p226_p0 = por %p225_p13, %p224_p12 }
  0x1e   :  { %p227_p1 = pnand %p226_p0, %p220_p11 }
  0x20   :  { %230 = shalt.err (!%p227_p1)
}
  0x21   :  { %29 = dma.hbm_to_vmem [thread:$0]  %s338_s1, 64, %s27_s12, [#allocation6]  }
  0x22   :  { %253 = dma.done.wait [#allocation3], 64  }
  0x23   :  { %254 = vsyncadd [#allocation3], 4294967232 }
  0x24   :  { %255 = dma.done.wait [#allocation6], 64  }
  0x25   :  { %256 = vsyncadd [#allocation6], 4294967232  ;;  %v41_v0 = vld [vmem:[#allocation2] sm:$0xf]  ;;  %s261_s4 = smov 126   ;;  %s262_s5 = smov 127  }
  0x26   :  { %84 = vrot.lane.b32.xlu1 %v41_v0, %s261_s4  ;;  %49 = vrot.lane.b32.xlu0 %v41_v0, %s262_s5  ;;  %v44_v1 = vld [vmem:[#allocation5] sm:$0xf]  ;;  %v45_v3 = vmul.f32 %v41_v0, %v41_v0  ;;  %s263_s6 = smov 125   ;;  %vm52_vm0 = vcmask 1039360   ;;  %vm87_vm1 = vcmask 1031168   ;;  %vm118_vm2 = vcmask 1022976  }
  0x27   :  { %v46_v2 = vmul.f32 %v44_v1, %v44_v1  ;;  %v304_v4 = vmul.f32 %v44_v1, %v41_v0  ;;  %s264_s1 = smov [#allocation7]  }
  0x28   :  { %s165_s7 = sshll.u32 %s264_s1, 4  ;;  %s166_s7 = int_to_ptr.vmem [resolvable:$true] %s165_s7 }
  0x29   :  { %s231_s8 = scalar_lea.vmem %s166_s7, 32  ;;  %p236_p3 = scmp.lt.s32.totalorder %s166_s7, %s166_s7 }
  0x2a   :  { %91 = vrot.lane.b32.xlu1 %v44_v1, %s261_s4  ;;  %57 = vrot.lane.b32.xlu0 %v44_v1, %s262_s5  ;;  %p232_p2 = scmp.ne.s32.totalorder %s166_s7, %s231_s8  ;;  %p237_p4 = scmp.lt.s32.totalorder %s231_s8, %s231_s8 }
  0x2c   :  { %p238_p5 = por %p237_p4, %p236_p3 }
  0x2e   :  { %71 = vrot.lane.b32.xlu1 %v46_v2, %s262_s5  ;;  %64 = vrot.lane.b32.xlu0 %v45_v3, %s262_s5  ;;  %p239_p6 = pnand %p238_p5, %p232_p2 }
  0x32   :  { %122 = vrot.lane.b32.xlu1 %v44_v1, %s263_s6  ;;  %115 = vrot.lane.b32.xlu0 %v41_v0, %s263_s6 }
  0x36   :  { %103 = vrot.lane.b32.xlu1 %v46_v2, %s261_s4  ;;  %97 = vrot.lane.b32.xlu0 %v45_v3, %s261_s4 }
  0x3a   :  { %134 = vrot.lane.b32.xlu1 %v46_v2, %s263_s6  ;;  %128 = vrot.lane.b32.xlu0 %v45_v3, %s263_s6 }
  0x3e   :  { %78 = vrot.lane.b32.xlu0 %v304_v4, %s262_s5  ;;  %109 = vrot.lane.b32.xlu1 %v304_v4, %s261_s4 }
  0x42   :  { %140 = vrot.lane.b32.xlu0 %v304_v4, %s263_s6 }
  0x98   :  { %v85_v5 = vpop.permute.xlu1 %84  ;;  %v50_v6 = vpop.permute.xlu0 %49 }
  0x99   :  { %v51_v7 = vrot.slane %v50_v6, 2  ;;  %v86_v13 = vrot.slane %v85_v5, 2 }
  0x9b   :  { %v53_v11 = vsel %vm52_vm0, %v50_v6, %v51_v7  ;;  %v88_v19 = vsel %vm87_vm1, %v85_v5, %v86_v13 }
  0x9c   :  { %v92_v8 = vpop.permute.xlu1 %91  ;;  %v58_v9 = vpop.permute.xlu0 %57  ;;  %v55_v17 = vadd.f32 %v53_v11, %v41_v0 }
  0x9d   :  { %v59_v10 = vrot.slane %v58_v9, 2  ;;  %v93_v14 = vrot.slane %v92_v8, 2 }
  0x9e   :  { %v90_v28 = vadd.f32 %v88_v19, %v55_v17 }
  0x9f   :  { %v60_v12 = vsel %vm52_vm0, %v58_v9, %v59_v10  ;;  %v94_v20 = vsel %vm87_vm1, %v92_v8, %v93_v14 }
  0xa0   :  { %v72_v15 = vpop.permute.xlu1 %71  ;;  %v65_v16 = vpop.permute.xlu0 %64  ;;  %v62_v18 = vadd.f32 %v60_v12, %v44_v1 }
  0xa1   :  { %v73_v23 = vrot.slane %v72_v15, 2  ;;  %v66_v24 = vrot.slane %v65_v16, 2 }
  0xa2   :  { %v96_v27 = vadd.f32 %v94_v20, %v62_v18 }
  0xa3   :  { %v74_v35 = vsel %vm52_vm0, %v72_v15, %v73_v23  ;;  %v67_v36 = vsel %vm52_vm0, %v65_v16, %v66_v24 }
  0xa4   :  { %v123_v21 = vpop.permute.xlu1 %122  ;;  %v116_v22 = vpop.permute.xlu0 %115  ;;  %v76_v41 = vadd.f32 %v74_v35, %v46_v2  ;;  %v69_v42 = vadd.f32 %v67_v36, %v45_v3 }
  0xa5   :  { %v124_v25 = vrot.slane %v123_v21, 2  ;;  %v117_v26 = vrot.slane %v116_v22, 2 }
  0xa7   :  { %v125_v29 = vsel %vm118_vm2, %v123_v21, %v124_v25  ;;  %v119_v30 = vsel %vm118_vm2, %v116_v22, %v117_v26 }
  0xa8   :  { %v127_v31 = vadd.f32 %v125_v29, %v96_v27  ;;  %v121_v32 = vadd.f32 %v119_v30, %v90_v28  ;;  %v104_v33 = vpop.permute.xlu1 %103  ;;  %v98_v34 = vpop.permute.xlu0 %97 }
  0xa9   :  { %v105_v37 = vrot.slane %v104_v33, 2  ;;  %v99_v38 = vrot.slane %v98_v34, 2 }
  0xaa   :  { %v152_v43 = vmul.f32 %v127_v31, %v127_v31  ;;  %v149_v44 = vmul.f32 %v121_v32, %v121_v32  ;;  %v146_v8 = vmul.f32 %v127_v31, %v121_v32 }
  0xab   :  { %v106_v39 = vsel %vm87_vm1, %v104_v33, %v105_v37  ;;  %v100_v40 = vsel %vm87_vm1, %v98_v34, %v99_v38 }
  0xac   :  { %v135_v45 = vpop.permute.xlu1 %134  ;;  %v129_v46 = vpop.permute.xlu0 %128  ;;  %v108_v49 = vadd.f32 %v106_v39, %v76_v41  ;;  %v102_v50 = vadd.f32 %v100_v40, %v69_v42  ;;  %v153_v53 = vmul.f32 0.25, %v152_v43  ;;  %v150_v54 = vmul.f32 0.25, %v149_v44 }
  0xad   :  { %v136_v47 = vrot.slane %v135_v45, 2  ;;  %v130_v48 = vrot.slane %v129_v46, 2  ;;  %v147_v10 = vmul.f32 0.25, %v146_v8 }
  0xaf   :  { %v137_v51 = vsel %vm118_vm2, %v135_v45, %v136_v47  ;;  %v131_v52 = vsel %vm118_vm2, %v129_v46, %v130_v48 }
  0xb0   :  { %v139_v55 = vadd.f32 %v137_v51, %v108_v49  ;;  %v133_v56 = vadd.f32 %v131_v52, %v102_v50  ;;  %v79_v57 = vpop.permute.xlu0 %78  ;;  %v110_v58 = vpop.permute.xlu1 %109 }
  0xb1   :  { %v80_v59 = vrot.slane %v79_v57, 2  ;;  %v111_v60 = vrot.slane %v110_v58, 2 }
  0xb2   :  { %v154_v61 = vsub.f32 %v139_v55, %v153_v53  ;;  %v151_v62 = vsub.f32 %v133_v56, %v150_v54 }
  0xb3   :  { %v81_v63 = vsel %vm52_vm0, %v79_v57, %v80_v59  ;;  %v112_v2 = vsel %vm87_vm1, %v110_v58, %v111_v60 }
  0xb4   :  { %v155_v0 = vmul.f32 %v154_v61, %v151_v62  ;;  %v83_v1 = vadd.f32 %v81_v63, %v304_v4  ;;  %v141_v3 = vpop.permute.xlu0 %140 }
  0xb5   :  { %v142_v5 = vrot.slane %v141_v3, 2 }
  0xb6   :  { %185 = vrsqrt.f32 %v155_v0  ;;  %v114_v6 = vadd.f32 %v112_v2, %v83_v1 }
  0xb7   :  { %v143_v7 = vsel %vm118_vm2, %v141_v3, %v142_v5 }
  0xb8   :  { %v145_v9 = vadd.f32 %v143_v7, %v114_v6 }
  0xba   :  { %v148_v11 = vsub.f32 %v145_v9, %v147_v10 }
  0xc0   :  { %v186_v12 = vpop.eup %185 }
  0xc1   :  { %v157_v13 = vmul.f32 %v186_v12, %v148_v11 }
  0xc3   :  { %158 = vst [vmem:[#allocation7] sm:$0x3] %v157_v13 }
  0xc4   :  { %242 = shalt.err (!%p239_p6)
}
  0xc5   :  { %s243_s11 = scalar_lea.hbm %s339_s2, 32 }
  0xc6   :  { %p244_p7 = scmp.ne.s32.totalorder %s339_s2, %s243_s11  ;;  %p247_p8 = scmp.lt.u32.totalorder %s243_s11, %s339_s2 }
  0xc8   :  { %p249_p9 = pnand %p247_p8, %p244_p7 }
  0xca   :  { %252 = shalt.err (!%p249_p9)
}
  0xcb   :  { %168 = dma.vmem_to_hbm [thread:$0]  %s166_s7, 32, %s339_s2, [#allocation4]  }
  0xcc   :  { %257 = dma.done.wait [#allocation4], 32  }
  0xcd   :  { %258 = vsyncadd [#allocation4], 4294967264 }
  0xce   :  { %172 = vsyncpa [#allocation3], 1 }
  0xcf   :  { %173 = vsyncpa [#allocation6], 1 }
  0xd0   :  { %174 = vsyncpa [#allocation4], 1 }

</bundles_post_ra>
